<compile_context>
chip_gen: v6e
topology: v6e:2x2x1
jax: 0.10.0
libtpu: 0.0.40
codegen_flags: <defaults>
</compile_context>

<pallas_src>
import jax
import jax.numpy as jnp
from jax.experimental import pallas as pl
from jax.experimental.pallas import tpu as pltpu


def _distance_kernel(x_ref, out_ref):
    # x_ref:  (6, TS) VMEM block -- rows [p0.x, p0.y, p0.z, p1.x, p1.y, p1.z],
    #                               systems on the lane axis.
    # out_ref: (1, TS) VMEM block -- one distance per system, lane-dense.
    x = x_ref[...]
    d = x[0:3, :] - x[3:6, :]                    # (3, TS)  pure VALU
    d2 = d * d                                   # (3, TS)  pure VALU
    s = d2[0:1, :] + d2[1:2, :] + d2[2:3, :]     # (1, TS)  unrolled, no XLU reduce
    out_ref[...] = jnp.sqrt(s)


def _round_up(x, m):
    return ((x + m - 1) // m) * m


def distance_features(positions, atom_ids, *, min_pallas_systems=4096):
    """positions: (S, N, 3) float; atom_ids: (2,) int -> (S, 1) float32 distances.

    Mirrors Distance.forward for the non-empty case with two selected atoms.
    """
    S, N, three = positions.shape
    assert three == 3
    # Mirrors the reference's `len(selected_atoms) != 2` ValueError.
    assert atom_ids.shape == (2,), "the model should be given two atoms to compute a distance"
    # TODO(synk): the PyTorch reference computes float64 distances; TPU Pallas
    # computes/returns float32 (~1e-7 relative error).
    # TODO(synk): the reference's empty-system branch, out-of-range atom-index
    # ValueError, and metatensor Labels/TensorBlock/TensorMap metadata plumbing
    # have no Pallas equivalent and are not reproduced here (jit gather clamps
    # out-of-range indices instead of raising).
    ids = atom_ids.astype(jnp.int32)

    # Gather only the two selected atom rows first (original dtype), cast after:
    # avoids converting/moving the whole (S, N, 3) array when input is f64.
    p0 = positions[:, ids[0], :]                 # (S, 3)
    p1 = positions[:, ids[1], :]                 # (S, 3)

    if S < min_pallas_systems:
        # Small-S fast path: ~6 FLOPs / 28 bytes per system is pure launch
        # overhead for Pallas -- one fused XLA elementwise is strictly faster.
        d = (p0 - p1).astype(jnp.float32)
        return jnp.sqrt(jnp.sum(d * d, axis=-1, keepdims=True))

    # Single (6, S) slab, systems on the lane axis. Layout plumbing only; the
    # distance math stays in the kernel.
    sel = jnp.concatenate([p0.T, p1.T], axis=0).astype(jnp.float32)  # (6, S)

    LANES = 128
    s_128 = _round_up(S, LANES)
    ts = min(s_128, 32768)          # 768 KiB input block per step; 1 grid step
    s_pad = _round_up(s_128, ts)    # up to 32768 systems, >=2 steps beyond that
    if s_pad != S:
        sel = jnp.pad(sel, ((0, 0), (0, s_pad - S)))

    grid = (s_pad // ts,)
    out = pl.pallas_call(
        _distance_kernel,
        out_shape=jax.ShapeDtypeStruct((1, s_pad), jnp.float32),
        grid=grid,
        in_specs=[pl.BlockSpec((6, ts), lambda i: (0, i))],
        out_specs=pl.BlockSpec((1, ts), lambda i: (0, i)),
        compiler_params=pltpu.CompilerParams(
            dimension_semantics=("parallel",)),   # shards S across both TCs on v7x
    )(sel)
    return out[0, :S].reshape(S, 1)


if __name__ == "__main__":
    key = jax.random.PRNGKey(0)
    S, N = 2, 8  # 2 systems, 8 atoms each (small shapes per the module's semantics)
    positions = jax.random.normal(key, (S, N, 3), dtype=jnp.float32)
    atom_ids = jnp.array([1, 5], dtype=jnp.int32)  # "selected_atoms": two atom indices

    # pure-JAX reference of the same semantics
    ref = jnp.sqrt(
        jnp.sum((positions[:, atom_ids[0], :] - positions[:, atom_ids[1], :]) ** 2, axis=-1)
    ).reshape(-1, 1)

    # Small-S fast path (no Pallas launch -- the default for S=2).
    out_fast = jax.block_until_ready(distance_features(positions, atom_ids))
    # Force the Pallas kernel path at the same small shapes to exercise it.
    out_pallas = jax.block_until_ready(
        distance_features(positions, atom_ids, min_pallas_systems=0))

    for out in (out_fast, out_pallas):
        assert out.shape == (S, 1)
        assert out.dtype == jnp.float32
        assert jnp.allclose(out, ref, atol=1e-6, rtol=1e-6)
    print("KERNEL_OK")
</pallas_src>

<mosaic_0001>
module attributes {stable_mosaic.version = 11 : i64} {
  func.func @_distance_kernel(%arg0: i32, %arg1: memref<6x128xf32, #tpu.memory_space<vmem>>, %arg2: memref<1x128xf32, #tpu.memory_space<vmem>>) attributes {dimension_semantics = [#tpu.dimension_semantics<parallel>], iteration_bounds = array<i64: 1>, scalar_prefetch = 0 : i64, scratch_operands = 0 : i64, tpu.core_type = #tpu.core_type<tc>, window_params = [{transform_indices = @transform_0, window_bounds = array<i64: 6, 128>}, {transform_indices = @transform_1, window_bounds = array<i64: 1, 128>}]} {
    %c0 = arith.constant 0 : index
    %c0_0 = arith.constant 0 : index
    %0 = vector.load %arg1[%c0, %c0_0] : memref<6x128xf32, #tpu.memory_space<vmem>>, vector<6x128xf32>
    %1 = vector.extract_strided_slice %0 {offsets = [0, 0], sizes = [3, 128], strides = [1, 1]} : vector<6x128xf32> to vector<3x128xf32>
    %2 = vector.extract_strided_slice %0 {offsets = [3, 0], sizes = [3, 128], strides = [1, 1]} : vector<6x128xf32> to vector<3x128xf32>
    %3 = arith.subf %1, %2 : vector<3x128xf32>
    %4 = arith.mulf %3, %3 : vector<3x128xf32>
    %5 = vector.extract_strided_slice %4 {offsets = [0, 0], sizes = [1, 128], strides = [1, 1]} : vector<3x128xf32> to vector<1x128xf32>
    %6 = vector.extract_strided_slice %4 {offsets = [1, 0], sizes = [1, 128], strides = [1, 1]} : vector<3x128xf32> to vector<1x128xf32>
    %7 = arith.addf %5, %6 : vector<1x128xf32>
    %8 = vector.extract_strided_slice %4 {offsets = [2, 0], sizes = [1, 128], strides = [1, 1]} : vector<3x128xf32> to vector<1x128xf32>
    %9 = arith.addf %7, %8 : vector<1x128xf32>
    %10 = math.sqrt %9 : vector<1x128xf32>
    %c0_1 = arith.constant 0 : index
    %c0_2 = arith.constant 0 : index
    %11 = vector.load %arg2[%c0_1, %c0_2] : memref<1x128xf32, #tpu.memory_space<vmem>>, vector<1x128xf32>
    tpu.vector_store %arg2[%c0_1, %c0_2], %10 {strides = array<i32>} : memref<1x128xf32, #tpu.memory_space<vmem>>, vector<1x128xf32>,
    return
  }
  func.func @transform_0(%arg0: i32) -> (i32, i32) {
    %c0_i32 = arith.constant 0 : i32
    %c0_i32_0 = arith.constant 0 : i32
    return %c0_i32, %arg0 : i32, i32
  }
  func.func @transform_1(%arg0: i32) -> (i32, i32) {
    %c0_i32 = arith.constant 0 : i32
    %c0_i32_0 = arith.constant 0 : i32
    return %c0_i32, %arg0 : i32, i32
  }
}

</mosaic_0001>

<bundles_post_ra>
// kernel: tpu_custom_call.1
= control target key start
LH: loop header
LB: loop body
LE: loop exit
PB: predicated region body
PF: predicated region fallthrough
CT: control target
= control target key end

     0   :  { %6 = vsyncpa [#allocation3], 0  ;;  %s123_s0 = inlined_call_operand.hbm [shape: f32[6,128], index: 0, kind: input, shape index: {}]   ;;  %s124_s1 = inlined_call_operand.hbm [shape: f32[1,128], index: 1, kind: output, shape index: {}]  }
   0x1   :  { %7 = vsyncpa [#allocation4], 0  ;;  %s105_s6 = smov [#allocation2]  }
   0x2   :  { %s14_s7 = sshll.u32 %s105_s6, 4  ;;  %s15_s7 = int_to_ptr.vmem [resolvable:$true] %s14_s7 }
   0x3   :  { %s69_s8 = scalar_lea.vmem %s15_s7, 128  ;;  %p74_p1 = scmp.lt.s32.totalorder %s15_s7, %s15_s7 }
   0x4   :  { %p70_p0 = scmp.ne.s32.totalorder %s15_s7, %s69_s8  ;;  %p75_p2 = scmp.lt.s32.totalorder %s69_s8, %s69_s8 }
   0x6   :  { %p76_p3 = por %p75_p2, %p74_p1 }
   0x8   :  { %p77_p4 = pnand %p76_p3, %p70_p0 }
   0xa   :  { %80 = shalt.err (!%p77_p4)
}
   0xb   :  { %17 = dma.hbm_to_vmem [thread:$0]  %s123_s0, 128, %s15_s7, [#allocation3]  }
   0xc   :  { %101 = dma.done.wait [#allocation3], 128  }
   0xd   :  { %102 = vsyncadd [#allocation3], 4294967168  ;;  %v21_v0 = vld [vmem:[#allocation2] sm:$0x3f]  ;;  %s106_s11 = smov [#allocation5]  }
   0xe   :  { %v23_v1 = vrot.slane %v21_v0, 3  ;;  %s48_s12 = sshll.u32 %s106_s11, 4  ;;  %s49_s12 = int_to_ptr.vmem [resolvable:$true] %s48_s12 }
   0xf   :  { %s81_s0 = scalar_lea.vmem %s49_s12, 16  ;;  %s85_s13 = scalar_lea.vmem %s49_s12, 32 }
  0x10   :  { %v25_v2 = vsub.f32 %v21_v0, %v23_v1  ;;  %p82_p5 = scmp.ne.s32.totalorder %s49_s12, %s81_s0  ;;  %p86_p6 = scmp.lt.s32.totalorder %s49_s12, %s49_s12 }
  0x11   :  { %p87_p7 = scmp.lt.s32.totalorder %s85_s13, %s81_s0 }
  0x12   :  { %v26_v3 = vmul.f32 %v25_v2, %v25_v2 }
  0x13   :  { %p88_p8 = por %p87_p7, %p86_p6 }
  0x14   :  { %v28_v4 = vrot.slane %v26_v3, 1  ;;  %v31_v5 = vrot.slane %v26_v3, 2 }
  0x15   :  { %p89_p9 = pnand %p88_p8, %p82_p5 }
  0x16   :  { %v30_v6 = vadd.f32 %v28_v4, %v26_v3 }
  0x18   :  { %v33_v7 = vadd.f32 %v31_v5, %v30_v6 }
  0x1a   :  { %59 = vrsqrt.f32 %v33_v7  ;;  %vm36_vm0 = vcmp.eq.f32.partialorder %v33_v7, inf  ;;  %v39_v9 = vand.u32 2147483648, %v33_v7  ;;  %vm38_vm1 = vcmp.eq.f32.partialorder %v33_v7, 0.0 }
  0x27   :  { %v60_v8 = vpop.eup %59 }
  0x28   :  { %v35_v10 = vmul.f32 %v60_v8, %v33_v7 }
  0x2a   :  { %v37_v11 = vsel %vm36_vm0, %v33_v7, %v35_v10 }
  0x2b   :  { %v40_v12 = vsel %vm38_vm1, %v39_v9, %v37_v11 }
  0x2c   :  { %41 = vst [vmem:[#allocation5] sm:$0x1] %v40_v12 }
  0x2d   :  { %92 = shalt.err (!%p89_p9)
}
  0x2e   :  { %51 = dma.vmem_to_hbm [thread:$0]  %s49_s12, 16, %s124_s1, [#allocation4]  }
  0x2f   :  { %103 = dma.done.wait [#allocation4], 16  }
  0x30   :  { %104 = vsyncadd [#allocation4], 4294967280 }
  0x31   :  { %55 = vsyncpa [#allocation3], 1 }
  0x32   :  { %56 = vsyncpa [#allocation4], 1 }

</bundles_post_ra>
